<compile_context>
chip_gen: v7x
topology: tpu7x:2x2x1
jax: 0.10.0
libtpu: 0.0.40
codegen_flags: <defaults>
</compile_context>

<pallas_src>
import functools

import jax
import jax.numpy as jnp
from jax.experimental import pallas as pl
from jax.experimental.pallas import tpu as pltpu


def _round_up(x, m):
    return ((x + m - 1) // m) * m


def _combiner3_kernel(h1_ref, h2_ref, gt_ref, w1_ref, b1_ref, w2_ref, b2_ref,
                      wh_ref, bh_ref, out_ref, *, z_dim):
    # Gating: two MXU matmuls (f32 accumulation) + tanh epilogue on the VPU/EUP.
    g1 = jnp.tanh(jnp.dot(h1_ref[...], w1_ref[...],
                          preferred_element_type=jnp.float32) + b1_ref[...])
    g2 = jnp.tanh(jnp.dot(h2_ref[...], w2_ref[...],
                          preferred_element_type=jnp.float32) + b2_ref[...])
    h_comb = (g1 + g2 + gt_ref[...]) * (1.0 / 3.0)

    # Fused loc|scale head: [Bt, g_dim] @ [Wloc^T | Wscale^T] -> [Bt, 2*z_dim].
    y = jnp.dot(h_comb.astype(wh_ref.dtype), wh_ref[...],
                preferred_element_type=jnp.float32) + bh_ref[...]

    # Stable softplus; applied only to the scale half via a lane mask.
    sp = jnp.maximum(y, 0.0) + jnp.log1p(jnp.exp(-jnp.abs(y)))
    lane = jax.lax.broadcasted_iota(jnp.int32, y.shape, 1)
    out_ref[...] = jnp.where(lane < z_dim, y, sp).astype(out_ref.dtype)


def prepare_combiner3_params(params, compute_dtype=jnp.float32):
    """One-time re-layout of PyTorch-layout params into kernel layout.

    params: W1[g,h1], b1[g], W2[g,h2], b2[g], Wloc[z,g], bloc[z],
            Wscale[z,g], bscale[z].
    """
    W1, b1 = params["W1"], params["b1"]
    W2, b2 = params["W2"], params["b2"]
    Wloc, bloc = params["Wloc"], params["bloc"]
    Wscale, bscale = params["Wscale"], params["bscale"]
    g_dim, h1_dim = W1.shape
    h2_dim = W2.shape[1]
    z_dim = Wloc.shape[0]

    # Gating weights transposed for row-major activations: [h, g].
    w1 = W1.T.astype(compute_dtype)
    w2 = W2.T.astype(compute_dtype)
    b1_r = b1.reshape(1, g_dim).astype(jnp.float32)
    b2_r = b2.reshape(1, g_dim).astype(jnp.float32)

    # Fused head weight: [g_dim, 2*z_dim] = [Wloc^T | Wscale^T].
    w_head = jnp.concatenate([Wloc.T, Wscale.T], axis=1).astype(compute_dtype)
    b_head = jnp.concatenate([bloc, bscale]).reshape(1, 2 * z_dim).astype(jnp.float32)

    return dict(
        w1=w1, b1=b1_r, w2=w2, b2=b2_r,   # biases stay f32 (added to f32 acc)
        w_head=w_head, b_head=b_head,
        dims=(h1_dim, h2_dim, g_dim, z_dim),
        dtype=compute_dtype,
    )


def combiner3_forward(h1, h2, gt, kp, block_b=512):
    """h1: [B, h1_dim], h2: [B, h2_dim], gt: [B, g_dim] -> (loc, scale) [B, z_dim].

    Callers with a time axis should flatten (batch*time) into B before calling
    so the MXU M dimension is well utilized.
    """
    h1_dim, h2_dim, g_dim, z_dim = kp["dims"]
    dtype = kp["dtype"]
    B = h1.shape[0]

    # Batch tiling: multiple of the sublane packing (8 for f32, 16 for bf16).
    min_rows = 16 if dtype == jnp.bfloat16 else 8
    block_b = _round_up(min(block_b, _round_up(B, min_rows)), min_rows)
    B_pad = _round_up(B, block_b)

    h1_c = h1.astype(dtype)
    h2_c = h2.astype(dtype)
    gt_c = gt.astype(jnp.float32)   # residual add stays exact; never hits MXU
    if B_pad != B:
        pad = ((0, B_pad - B), (0, 0))
        h1_c = jnp.pad(h1_c, pad)
        h2_c = jnp.pad(h2_c, pad)
        gt_c = jnp.pad(gt_c, pad)

    grid = (B_pad // block_b,)
    kernel = functools.partial(_combiner3_kernel, z_dim=z_dim)

    out = pl.pallas_call(
        kernel,
        out_shape=jax.ShapeDtypeStruct((B_pad, 2 * z_dim), jnp.float32),
        grid=grid,
        in_specs=[
            # activations: tiled over the batch grid axis (auto double-buffered)
            pl.BlockSpec((block_b, h1_dim), lambda i: (i, 0)),
            pl.BlockSpec((block_b, h2_dim), lambda i: (i, 0)),
            pl.BlockSpec((block_b, g_dim), lambda i: (i, 0)),
            # weights / biases: constant index_map -> stay VMEM-resident
            pl.BlockSpec((h1_dim, g_dim), lambda i: (0, 0)),
            pl.BlockSpec((1, g_dim), lambda i: (0, 0)),
            pl.BlockSpec((h2_dim, g_dim), lambda i: (0, 0)),
            pl.BlockSpec((1, g_dim), lambda i: (0, 0)),
            pl.BlockSpec((g_dim, 2 * z_dim), lambda i: (0, 0)),
            pl.BlockSpec((1, 2 * z_dim), lambda i: (0, 0)),
        ],
        out_specs=pl.BlockSpec((block_b, 2 * z_dim), lambda i: (i, 0)),
        compiler_params=pltpu.CompilerParams(
            dimension_semantics=("parallel",)),
    )(h1_c, h2_c, gt_c,
      kp["w1"], kp["b1"], kp["w2"], kp["b2"], kp["w_head"], kp["b_head"])

    loc = out[:B, :z_dim]
    scale = out[:B, z_dim:]
    return loc, scale


def _init_linear(key, out_dim, in_dim):
    # Deterministic synthetic init (PyTorch-style uniform bound), f32.
    kw, kb = jax.random.split(key)
    bound = 1.0 / jnp.sqrt(in_dim)
    W = jax.random.uniform(kw, (out_dim, in_dim), jnp.float32, -bound, bound)
    b = jax.random.uniform(kb, (out_dim,), jnp.float32, -bound, bound)
    return W, b


if __name__ == "__main__":
    # Small shapes consistent with the module's forward (B includes flattened time).
    B, z_dim, h1_dim, h2_dim, g_dim = 20, 16, 32, 64, 128

    key = jax.random.PRNGKey(0)
    k_h1, k_h2, k_gt, k1, k2, k3, k4 = jax.random.split(key, 7)

    h1 = jax.random.normal(k_h1, (B, h1_dim), jnp.float32)
    h2 = jax.random.normal(k_h2, (B, h2_dim), jnp.float32)
    gt = jax.random.normal(k_gt, (B, g_dim), jnp.float32)

    W1, b1 = _init_linear(k1, g_dim, h1_dim)
    W2, b2 = _init_linear(k2, g_dim, h2_dim)
    Wloc, bloc = _init_linear(k3, z_dim, g_dim)
    Wscale, bscale = _init_linear(k4, z_dim, g_dim)

    params = dict(W1=W1, b1=b1, W2=W2, b2=b2,
                  Wloc=Wloc, bloc=bloc, Wscale=Wscale, bscale=bscale)

    # Pure-JAX reference.
    h_comb = (jnp.tanh(h1 @ W1.T + b1) + jnp.tanh(h2 @ W2.T + b2) + gt) / 3.0
    loc_ref = h_comb @ Wloc.T + bloc
    scale_ref = jax.nn.softplus(h_comb @ Wscale.T + bscale)

    # f32 path (small batch tile to exercise a multi-step grid + row padding).
    kp_f32 = prepare_combiner3_params(params, jnp.float32)
    loc, scale = combiner3_forward(h1, h2, gt, kp_f32, block_b=8)
    jax.block_until_ready((loc, scale))
    assert loc.shape == (B, z_dim) and scale.shape == (B, z_dim)
    assert jnp.allclose(loc, loc_ref, atol=1e-4), "loc mismatch (f32)"
    assert jnp.allclose(scale, scale_ref, atol=1e-4), "scale mismatch (f32)"

    # bf16-fed MXU path (v6e/v7x bandwidth optimization); epilogue stays f32.
    kp_bf16 = prepare_combiner3_params(params, jnp.bfloat16)
    loc16, scale16 = combiner3_forward(h1, h2, gt, kp_bf16, block_b=16)
    jax.block_until_ready((loc16, scale16))
    assert jnp.allclose(loc16, loc_ref, atol=1e-1, rtol=1e-1), "loc mismatch (bf16)"
    assert jnp.allclose(scale16, scale_ref, atol=1e-1, rtol=1e-1), "scale mismatch (bf16)"

    print("KERNEL_OK")
</pallas_src>

<mosaic_0001>
module attributes {stable_mosaic.version = 11 : i64} {
  func.func @_combiner3_kernel(%arg0: i32, %arg1: memref<8x32xf32, #tpu.memory_space<vmem>>, %arg2: memref<8x64xf32, #tpu.memory_space<vmem>>, %arg3: memref<8x128xf32, #tpu.memory_space<vmem>>, %arg4: memref<32x128xf32, #tpu.memory_space<vmem>>, %arg5: memref<1x128xf32, #tpu.memory_space<vmem>>, %arg6: memref<64x128xf32, #tpu.memory_space<vmem>>, %arg7: memref<1x128xf32, #tpu.memory_space<vmem>>, %arg8: memref<128x32xf32, #tpu.memory_space<vmem>>, %arg9: memref<1x32xf32, #tpu.memory_space<vmem>>, %arg10: memref<8x32xf32, #tpu.memory_space<vmem>>) attributes {dimension_semantics = [#tpu.dimension_semantics<parallel>], iteration_bounds = array<i64: 3>, scalar_prefetch = 0 : i64, scratch_operands = 0 : i64, tpu.core_type = #tpu.core_type<tc>, window_params = [{transform_indices = @transform_0, window_bounds = array<i64: 8, 32>}, {transform_indices = @transform_1, window_bounds = array<i64: 8, 64>}, {transform_indices = @transform_2, window_bounds = array<i64: 8, 128>}, {pipeline_mode = #tpu.pipeline_mode<synchronous>, transform_indices = @transform_3, window_bounds = array<i64: 32, 128>}, {pipeline_mode = #tpu.pipeline_mode<synchronous>, transform_indices = @transform_4, window_bounds = array<i64: 1, 128>}, {pipeline_mode = #tpu.pipeline_mode<synchronous>, transform_indices = @transform_5, window_bounds = array<i64: 64, 128>}, {pipeline_mode = #tpu.pipeline_mode<synchronous>, transform_indices = @transform_6, window_bounds = array<i64: 1, 128>}, {pipeline_mode = #tpu.pipeline_mode<synchronous>, transform_indices = @transform_7, window_bounds = array<i64: 128, 32>}, {pipeline_mode = #tpu.pipeline_mode<synchronous>, transform_indices = @transform_8, window_bounds = array<i64: 1, 32>}, {transform_indices = @transform_9, window_bounds = array<i64: 8, 32>}]} {
    %c0 = arith.constant 0 : index
    %c0_0 = arith.constant 0 : index
    %0 = vector.load %arg1[%c0, %c0_0] : memref<8x32xf32, #tpu.memory_space<vmem>>, vector<8x32xf32>
    %c0_1 = arith.constant 0 : index
    %c0_2 = arith.constant 0 : index
    %1 = vector.load %arg4[%c0_1, %c0_2] : memref<32x128xf32, #tpu.memory_space<vmem>>, vector<32x128xf32>
    %cst = arith.constant dense<0.000000e+00> : vector<8x128xf32>
    %2 = tpu.matmul %0, %1, %cst {dimension_numbers = #tpu.dot_dimension_numbers<[1], [0], [0], [1], [0, 0, 1, 1], [], []>} : vector<8x32xf32>, vector<32x128xf32>, vector<8x128xf32> -> vector<8x128xf32>
    %c0_3 = arith.constant 0 : index
    %c0_4 = arith.constant 0 : index
    %3 = vector.load %arg5[%c0_3, %c0_4] : memref<1x128xf32, #tpu.memory_space<vmem>>, vector<1x128xf32>
    %4 = vector.broadcast %3 : vector<1x128xf32> to vector<8x128xf32>
    %5 = arith.addf %2, %4 : vector<8x128xf32>
    %6 = math.tanh %5 : vector<8x128xf32>
    %c0_5 = arith.constant 0 : index
    %c0_6 = arith.constant 0 : index
    %7 = vector.load %arg2[%c0_5, %c0_6] : memref<8x64xf32, #tpu.memory_space<vmem>>, vector<8x64xf32>
    %c0_7 = arith.constant 0 : index
    %c0_8 = arith.constant 0 : index
    %8 = vector.load %arg6[%c0_7, %c0_8] : memref<64x128xf32, #tpu.memory_space<vmem>>, vector<64x128xf32>
    %cst_9 = arith.constant dense<0.000000e+00> : vector<8x128xf32>
    %9 = tpu.matmul %7, %8, %cst_9 {dimension_numbers = #tpu.dot_dimension_numbers<[1], [0], [0], [1], [0, 0, 1, 1], [], []>} : vector<8x64xf32>, vector<64x128xf32>, vector<8x128xf32> -> vector<8x128xf32>
    %c0_10 = arith.constant 0 : index
    %c0_11 = arith.constant 0 : index
    %10 = vector.load %arg7[%c0_10, %c0_11] : memref<1x128xf32, #tpu.memory_space<vmem>>, vector<1x128xf32>
    %11 = vector.broadcast %10 : vector<1x128xf32> to vector<8x128xf32>
    %12 = arith.addf %9, %11 : vector<8x128xf32>
    %13 = math.tanh %12 : vector<8x128xf32>
    %14 = arith.addf %6, %13 : vector<8x128xf32>
    %c0_12 = arith.constant 0 : index
    %c0_13 = arith.constant 0 : index
    %15 = vector.load %arg3[%c0_12, %c0_13] : memref<8x128xf32, #tpu.memory_space<vmem>>, vector<8x128xf32>
    %16 = arith.addf %14, %15 : vector<8x128xf32>
    %cst_14 = arith.constant 0.333333343 : f32
    %17 = vector.broadcast %cst_14 : f32 to vector<8x128xf32>
    %18 = arith.mulf %16, %17 : vector<8x128xf32>
    %c0_15 = arith.constant 0 : index
    %c0_16 = arith.constant 0 : index
    %19 = vector.load %arg8[%c0_15, %c0_16] : memref<128x32xf32, #tpu.memory_space<vmem>>, vector<128x32xf32>
    %cst_17 = arith.constant dense<0.000000e+00> : vector<8x32xf32>
    %20 = tpu.matmul %18, %19, %cst_17 {dimension_numbers = #tpu.dot_dimension_numbers<[1], [0], [0], [1], [0, 0, 1, 1], [], []>} : vector<8x128xf32>, vector<128x32xf32>, vector<8x32xf32> -> vector<8x32xf32>
    %c0_18 = arith.constant 0 : index
    %c0_19 = arith.constant 0 : index
    %21 = vector.load %arg9[%c0_18, %c0_19] : memref<1x32xf32, #tpu.memory_space<vmem>>, vector<1x32xf32>
    %22 = vector.broadcast %21 : vector<1x32xf32> to vector<8x32xf32>
    %23 = arith.addf %20, %22 : vector<8x32xf32>
    %cst_20 = arith.constant 0.000000e+00 : f32
    %24 = vector.broadcast %cst_20 : f32 to vector<8x32xf32>
    %25 = arith.maximumf %23, %24 : vector<8x32xf32>
    %26 = math.absf %23 : vector<8x32xf32>
    %cst_21 = arith.constant 0.000000e+00 : f32
    %27 = vector.broadcast %cst_21 : f32 to vector<8x32xf32>
    %28 = arith.subf %27, %26 : vector<8x32xf32>
    %29 = math.exp %28 : vector<8x32xf32>
    %30 = math.log1p %29 : vector<8x32xf32>
    %31 = arith.addf %25, %30 : vector<8x32xf32>
    %32 = tpu.iota {dimensions = array<i32: 1>} : vector<8x32xi32>
    %c16_i32 = arith.constant 16 : i32
    %33 = vector.broadcast %c16_i32 : i32 to vector<8x32xi32>
    %34 = arith.cmpi slt, %32, %33 : vector<8x32xi32>
    %35 = arith.select %34, %23, %31 : vector<8x32xi1>, vector<8x32xf32>
    %c0_22 = arith.constant 0 : index
    %c0_23 = arith.constant 0 : index
    %36 = vector.load %arg10[%c0_22, %c0_23] : memref<8x32xf32, #tpu.memory_space<vmem>>, vector<8x32xf32>
    tpu.vector_store %arg10[%c0_22, %c0_23], %35 {strides = array<i32>} : memref<8x32xf32, #tpu.memory_space<vmem>>, vector<8x32xf32>,
    return
  }
  func.func @transform_0(%arg0: i32) -> (i32, i32) {
    %c0_i32 = arith.constant 0 : i32
    %c0_i32_0 = arith.constant 0 : i32
    return %arg0, %c0_i32 : i32, i32
  }
  func.func @transform_1(%arg0: i32) -> (i32, i32) {
    %c0_i32 = arith.constant 0 : i32
    %c0_i32_0 = arith.constant 0 : i32
    return %arg0, %c0_i32 : i32, i32
  }
  func.func @transform_2(%arg0: i32) -> (i32, i32) {
    %c0_i32 = arith.constant 0 : i32
    %c0_i32_0 = arith.constant 0 : i32
    return %arg0, %c0_i32 : i32, i32
  }
  func.func @transform_3(%arg0: i32) -> (i32, i32) {
    %c0_i32 = arith.constant 0 : i32
    %c0_i32_0 = arith.constant 0 : i32
    %c0_i32_1 = arith.constant 0 : i32
    return %c0_i32, %c0_i32_0 : i32, i32
  }
  func.func @transform_4(%arg0: i32) -> (i32, i32) {
    %c0_i32 = arith.constant 0 : i32
    %c0_i32_0 = arith.constant 0 : i32
    %c0_i32_1 = arith.constant 0 : i32
    return %c0_i32, %c0_i32_0 : i32, i32
  }
  func.func @transform_5(%arg0: i32) -> (i32, i32) {
    %c0_i32 = arith.constant 0 : i32
    %c0_i32_0 = arith.constant 0 : i32
    %c0_i32_1 = arith.constant 0 : i32
    return %c0_i32, %c0_i32_0 : i32, i32
  }
  func.func @transform_6(%arg0: i32) -> (i32, i32) {
    %c0_i32 = arith.constant 0 : i32
    %c0_i32_0 = arith.constant 0 : i32
    %c0_i32_1 = arith.constant 0 : i32
    return %c0_i32, %c0_i32_0 : i32, i32
  }
  func.func @transform_7(%arg0: i32) -> (i32, i32) {
    %c0_i32 = arith.constant 0 : i32
    %c0_i32_0 = arith.constant 0 : i32
    %c0_i32_1 = arith.constant 0 : i32
    return %c0_i32, %c0_i32_0 : i32, i32
  }
  func.func @transform_8(%arg0: i32) -> (i32, i32) {
    %c0_i32 = arith.constant 0 : i32
    %c0_i32_0 = arith.constant 0 : i32
    %c0_i32_1 = arith.constant 0 : i32
    return %c0_i32, %c0_i32_0 : i32, i32
  }
  func.func @transform_9(%arg0: i32) -> (i32, i32) {
    %c0_i32 = arith.constant 0 : i32
    %c0_i32_0 = arith.constant 0 : i32
    return %arg0, %c0_i32 : i32, i32
  }
}

</mosaic_0001>

<bundles_post_ra>
// kernel: tpu_custom_call.1
= control target key start
LH: loop header
LB: loop body
LE: loop exit
PB: predicated region body
PF: predicated region fallthrough
CT: control target
= control target key end

     0   :  { %s1441_s0 = inlined_call_operand.vmem [shape: f32[24,32], index: 0, kind: input, shape index: {}]   ;;  %s1442_s1 = inlined_call_operand.vmem [shape: f32[24,64], index: 1, kind: input, shape index: {}]   ;;  %s1443_s2 = inlined_call_operand.hbm [shape: f32[24,128], index: 2, kind: input, shape index: {}]   ;;  %s1444_s3 = inlined_call_operand.vmem [shape: f32[32,128], index: 3, kind: input, shape index: {}]   ;;  %s1445_s4 = inlined_call_operand.vmem [shape: f32[1,128], index: 4, kind: input, shape index: {}]   ;;  %s1446_s5 = inlined_call_operand.vmem [shape: f32[64,128], index: 5, kind: input, shape index: {}]   ;;  %s1447_s6 = inlined_call_operand.vmem [shape: f32[1,128], index: 6, kind: input, shape index: {}]   ;;  %s1448_s7 = inlined_call_operand.vmem [shape: f32[128,32], index: 7, kind: input, shape index: {}]   ;;  %s1449_s8 = inlined_call_operand.vmem [shape: f32[1,32], index: 8, kind: input, shape index: {}]   ;;  %s1450_s9 = inlined_call_operand.hbm [shape: f32[24,32], index: 9, kind: output, shape index: {}]  }
   0x1   :  { %1453 = sst [smem:[#allocation8_spill]] %s1443_s2 }
   0x2   :  { %14 = vsyncpa [#allocation3], 0 }
   0x3   :  { %16 = vsyncpa [#allocation3 + $0x1], 0 }
   0x4   :  { %17 = vsyncpa [#allocation4], 0 }
   0x5   :  { %19 = vsyncpa [#allocation4 + $0x1], 0  ;;  %s1152_s30 = smov 0   ;;  %s1154_s10 = smov 0  }
   0x6   :  { %s1156_s11 = smov 0   ;;  %s1158_s12 = smov 0  }
   0x7 LB: > { %s1173_s13 = sadd.s32 4294967295, %s1095_s12   ;;  %s785_s14 = sadd.s32 4294967294, %s1095_s12   ;;  %s1095_s12 = sphi %s1158_s12, %s1468_s12   ;;  %s1091_s11 = sphi %s1156_s11, %s1467_s11   ;;  %s1087_s10 = sphi %s1154_s10, %s1466_s10   ;;  %s1083_s30 = sphi %s1152_s30, %s1465_s30  }
   0x8   : > { %s1177_s15 = sadd.s32 1, %s1095_s12   ;;  %s84_s16 = sadd.s32 1, %s1091_s11 }
   0x9   : > { %s81_s17 = ssub.s32 %s1095_s12, %s1177_s15  ;;  %p91_p0 = scmp.ne.s32.totalorder %s1091_s11, %s1087_s10 }
   0xa   : > { %p82_p1 = scmp.eq.s32.totalorder %s81_s17, 0  ;;  %p92_p2 = scmp.eq.s32.totalorder %s1095_s12, 0 }
   0xb   : > { %p97_p3 = scmp.ne.s32.totalorder %s1087_s10, %s1083_s30  ;;  %p98_p4 = scmp.eq.s32.totalorder %s1173_s13, 0 }
   0xc   : > { %s1189_s18 = scalar_select %p82_p1, %s1091_s11, %s84_s16  }
   0xd   : > { %p1191_p5 = por %p92_p2, %p91_p0  ;;  %p1195_p6 = por %p98_p4, %p97_p3 }
   0xe   : > { %p247_p7 = scmp.eq.s32.totalorder %s1173_s13, 2  ;;  %p253_p8 = scmp.eq.s32.totalorder %s785_s14, 2 }
   0xf   : > { %p954_p9 = scmp.lt.s32.totalorder %s1095_s12, 3  ;;  %s305_s23 = sand.u32 1, %s1091_s11  }
  0x10   : > { %p1201_p10 = por %p247_p7, %p91_p0  ;;  %p1205_p11 = por %p253_p8, %p97_p3 }
  0x11   : > { %s789_s24 = sshll.u32 %s1095_s12, 7  ;;  %s788_s25 = sshll.u32 %s305_s23, 3 }
  0x12   : > { %s1456_s21 = scalar_select %p1201_p10, 1, 0 }
  0x13   : > { %s1457_s22 = scalar_select %p1205_p11, 1, 0 }
  0x14   : > { %s1458_s2 = sld [smem:[#allocation8_spill]]  ;;  %s309_s29 = scalar_lea.vmem [#allocation2], %s788_s25 }
  0x15   : > { %s316_s14 = sshll.u32 %s309_s29, 4  ;;  %p1218_p12 = pnand %p954_p9, %p1191_p5  ;;  %s1222_s14 = int_to_ptr.vmem [resolvable:$true] %s316_s14 }
  0x16   : > { %s306_s17 = scalar_lea.sflag [#allocation3], %s305_s23 }
  0x17   : > { %p1001_p2 = pneg %p1218_p12 }
  0x1a   : > { %s1214_s28 = scalar_lea.hbm %s1458_s2, %s789_s24  ;;  %s1004_s26 = scalar_lea.hbm %s1458_s2, 384 }
  0x1b   : > { %s999_s24 = scalar_lea.hbm %s1214_s28, 128  ;;  %p1005_p5 = scmp.lt.u32.totalorder %s1214_s28, %s1458_s2 }
  0x1c   : > { %p1000_p1 = scmp.ne.s32.totalorder %s1214_s28, %s999_s24  ;;  %p1006_p7 = scmp.lt.u32.totalorder %s1004_s26, %s999_s24 }
  0x1d   : > { %p1008_p9 = scmp.lt.u32.totalorder %s999_s24, %s1214_s28 }
  0x1e   : > { %p1002_p3 = pnand %p1001_p2, %p1000_p1  ;;  %p1007_p8 = por %p1006_p7, %p1005_p5 }
  0x20   : > { %p1003_p4 = pneg %p1002_p3  ;;  %p1009_p13 = por %p1008_p9, %p1007_p8 }
  0x22   : > { %p1010_p0 = pnand %p1009_p13, %p1003_p4 }
  0x24   : > { %1013 = shalt.err (!%p1010_p0)
}
  0x25   : > { %s1014_s23 = scalar_lea.vmem %s1222_s14, 128  ;;  %s1097_s19 = smov [#allocation2]  }
  0x26   : > { %p1015_p1 = scmp.ne.s32.totalorder %s1222_s14, %s1014_s23  ;;  %s1019_s25 = sshll.u32 %s1097_s19, 4  ;;  %s1020_s25 = int_to_ptr.vmem [resolvable:$false] %s1019_s25 }
  0x27   : > { %s1021_s27 = scalar_lea.vmem %s1020_s25, 256  ;;  %p1022_p10 = scmp.lt.s32.totalorder %s1222_s14, %s1020_s25 }
  0x28   : > { %p1017_p3 = pnand %p1015_p1, %p1001_p2  ;;  %p1023_p5 = scmp.lt.s32.totalorder %s1021_s27, %s1014_s23 }
  0x2a   : > { %p1018_p11 = pneg %p1017_p3  ;;  %p1024_p7 = por %p1023_p5, %p1022_p10 }
  0x2c   : > { %p1025_p8 = pnand %p1024_p7, %p1018_p11 }
  0x2e   : > { %1028 = shalt.err (!%p1025_p8)
}
  0x2f   : > { %949 = dma.hbm_to_vmem [thread:$0]  (!%p1218_p12), %s1214_s28, 128, %s1222_s14, %s306_s17  }
  0x30   : > { %p1460_p13 = scmp.lt.s32.totalorder %s1095_s12, 4  ;;  %p1461_p0 = scmp.ge.s32.totalorder %s1095_s12, 1 }
  0x32   : > { %p322_p2 = pnand %p1461_p0, %p1460_p13 }
  0x33   : > { %s1256_s24 = sand.u32 (!%p322_p2), 1, %s1087_s10  }
  0x34   : > { %325 = sbr.rel (%p322_p2) target bundleno = 582 (0x246), region = 56  ;;  %s1452_s26 = sshll.u32 (!%p322_p2), %s1256_s24, 3 }
  0x35   : > { %s328_s29 = scalar_lea.sflag (!%p322_p2), [#allocation3], %s1256_s24  ;;  %s1262_s16 = scalar_lea.vmem (!%p322_p2), [#allocation2], %s1452_s26 }
  0x3b   : > { %1074 = dma.done.wait (%p1195_p6), %s328_s29, 128  }
  0x3c   : > { %1076 = vsyncadd (%p1195_p6), %s328_s29, 4294967168  ;;  %p374_p10 = scmp.lt.s32.totalorder %s1173_s13, 2  ;;  %v1098_v0 = vmov 0.0|0.0   ;;  %vm1099_vm0 = vmmov 0   ;;  %v1100_v1 = vmov 0.0   ;;  %v383_v2 = vld [vmem:[%s1444_s3] sm:$0xff] }
  0x3d   : > { %900 = vmatprep.subr.bf16.mxu1 %v1098_v0  ;;  %843 = vmatprep.mubr.msk.f32.mxu1 %vm1099_vm0, %v1100_v1  ;;  %v384_v3 = vld [vmem:[%s1444_s3 + $0x8] sm:$0xff]  ;;  %v385_v4 = vld [vmem:[%s1444_s3 + $0x10] sm:$0xff]  ;;  %v386_v6 = vld [vmem:[%s1444_s3 + $0x18] sm:$0xff]  ;;  %vm394_vm1 = vcmask 261120   ;;  %vm485_vm2 = vcmask 523264   ;;  %p1463_p11 = scmp.ne.s32.totalorder %s1456_s21, 0 }
  0x3e   : > { %918 = vmatprep.subr.bf16.mxu0 %v1098_v0  ;;  %897 = vmatprep.mubr.msk.f32.mxu0 %vm1099_vm0, %v1100_v1  ;;  %s1274_s28 = scalar_select %p374_p10, %s1173_s13, 2  ;;  %v901_v5 = vpack.c.bf16 %v384_v3, %v383_v2  ;;  %v904_v7 = vpack.c.bf16 %v386_v6, %v385_v4  ;;  %v470_v8 = vld [vmem:[%s1446_s5] sm:$0xff]  ;;  %v471_v9 = vld [vmem:[%s1446_s5 + $0x8] sm:$0xff]  ;;  %v472_v12 = vld [vmem:[%s1446_s5 + $0x10] sm:$0xff]  ;;  %v672_v6 = vlaneseq }
  0x3f   : > { %v907_v11 = vpack.c.bf16 %v471_v9, %v470_v8  ;;  %v473_v13 = vld [vmem:[%s1446_s5 + $0x18] sm:$0xff]  ;;  %v474_v15 = vld [vmem:[%s1446_s5 + $0x20] sm:$0xff]  ;;  %v475_v16 = vld [vmem:[%s1446_s5 + $0x28] sm:$0xff]  ;;  %s1101_s20 = smov [#allocation5]  }
  0x40   : > { %s793_s26 = sshll.u32 %s1274_s28, 3  ;;  %902 = vmatpush3.bf16.msra.mxu1 %v901_v5  ;;  %v910_v14 = vpack.c.bf16 %v473_v13, %v472_v12  ;;  %v913_v17 = vpack.c.bf16 %v475_v16, %v474_v15  ;;  %v476_v18 = vld [vmem:[%s1446_s5 + $0x30] sm:$0xff]  ;;  %v477_v19 = vld [vmem:[%s1446_s5 + $0x38] sm:$0xff]  ;;  %v564_v22 = vld [vmem:[%s1448_s7] sm:$0xff]  ;;  %v673_v9 = vand.u32 127, %v672_v6  ;;  %s1462_s28 = sshll.u32 %s1256_s24, 3 }
  0x41   : > { %903 = vmatprep.subr.bf16.mxu1 %v1098_v0  ;;  %s377_s2 = scalar_lea.vmem %s1441_s0, %s793_s26  ;;  %v916_v20 = vpack.c.bf16 %v477_v19, %v476_v18  ;;  %v565_v23 = vld [vmem:[%s1448_s7 + $0x8] sm:$0xff]  ;;  %v566_v25 = vld [vmem:[%s1448_s7 + $0x10] sm:$0xff]  ;;  %v567_v26 = vld [vmem:[%s1448_s7 + $0x18] sm:$0xff]  ;;  %s1033_s23 = sshll.u32 %s1101_s20, 4  ;;  %s1034_s23 = int_to_ptr.vmem [resolvable:$false] %s1033_s23 }
  0x42   : > { %v382_v10 = vld [vmem:[%s377_s2] sm:$0xff]  ;;  %s381_s2 = scalar_lea.vmem %s1442_s1, %s793_s26  ;;  %v919_v24 = vpack.c.bf16 %v565_v23, %v564_v22  ;;  %v922_v27 = vpack.c.bf16 %v567_v26, %v566_v25  ;;  %v569_v29 = vld [vmem:[%s1448_s7 + $0x28] sm:$0xff]  ;;  %v570_v31 = vld [vmem:[%s1448_s7 + $0x30] sm:$0xff]  ;;  %s373_s26 = scalar_lea.vmem [#allocation5], %s1462_s28  ;;  %vm674_vm4 = vcmp.lt.s32.totalorder %v673_v9, 16 }
  0x43   : > { %v469_v21 = vld [vmem:[%s381_s2] sm:$0xff]  ;;  %v571_v32 = vld [vmem:[%s1448_s7 + $0x38] sm:$0xff]  ;;  %v573_v35 = vld [vmem:[%s1448_s7 + $0x48] sm:$0xff]  ;;  %s691_s27 = sshll.u32 %s373_s26, 4  ;;  %s1035_s19 = scalar_lea.vmem %s1034_s23, 256  ;;  %s1399_s27 = int_to_ptr.vmem [resolvable:$true] %s691_s27 }
  0x44   : > { %905 = vmatpush3.bf16.msra.mxu1 %v904_v7  ;;  %920 = vmatpush3.bf16.msra.mxu0 %v919_v24  ;;  %v568_v28 = vld [vmem:[%s1448_s7 + $0x20] sm:$0xff]  ;;  %v928_v33 = vpack.c.bf16 %v571_v32, %v570_v31  ;;  %v574_v37 = vld [vmem:[%s1448_s7 + $0x50] sm:$0xff]  ;;  %v575_v38 = vld [vmem:[%s1448_s7 + $0x58] sm:$0xff]  ;;  %s1029_s17 = scalar_lea.vmem %s1399_s27, 128  ;;  %p1036_p9 = scmp.lt.s32.totalorder %s1399_s27, %s1034_s23 }
  0x45   : > { %906 = vmatprep.subr.bf16.mxu1 %v1098_v0  ;;  %921 = vmatprep.subr.bf16.mxu0 %v1098_v0  ;;  %v925_v30 = vpack.c.bf16 %v569_v29, %v568_v28  ;;  %v572_v34 = vld [vmem:[%s1448_s7 + $0x40] sm:$0xff]  ;;  %v934_v39 = vpack.c.bf16 %v575_v38, %v574_v37  ;;  %v577_v41 = vld [vmem:[%s1448_s7 + $0x68] sm:$0xff]  ;;  %v578_v43 = vld [vmem:[%s1448_s7 + $0x70] sm:$0xff]  ;;  %p1030_p6 = scmp.ne.s32.totalorder %s1399_s27, %s1029_s17  ;;  %p1037_p1 = scmp.lt.s32.totalorder %s1035_s19, %s1029_s17 }
  0x46   : > { %v931_v36 = vpack.c.bf16 %v573_v35, %v572_v34  ;;  %v576_v40 = vld [vmem:[%s1448_s7 + $0x60] sm:$0xff]  ;;  %v579_v44 = vld [vmem:[%s1448_s7 + $0x78] sm:$0xff] }
  0x47   : > { %844 = vmatmul.mubr.msk.f32.vlgmr.msra.gmra.mrb[0].mxu1 %vm394_vm1, %v382_v10  ;;  %v937_v42 = vpack.c.bf16 %v577_v41, %v576_v40  ;;  %v940_v45 = vpack.c.bf16 %v579_v44, %v578_v43  ;;  %v795_v48 = vld [vmem:[%s1445_s4] ss:$0 sm:$0xff]  ;;  %p1031_p12 = pnand %p1030_p6, %p1463_p11  ;;  %p1038_p3 = por %p1037_p1, %p1036_p9 }
  0x48   : > { %908 = vmatpush3.bf16.msra.mxu1 %v907_v11  ;;  %862 = vmatprep.mubr.msk.f32.mxu1 %vm1099_vm0, %v1100_v1  ;;  %v797_v50 = vld [vmem:[%s1447_s6] ss:$0 sm:$0xff] }
  0x49   : > { %909 = vmatprep.subr.bf16.mxu1 %v1098_v0  ;;  %923 = vmatpush3.bf16.msra.mxu0 %v922_v27  ;;  %v561_v56 = vld [vmem:[%s1262_s16] sm:$0xff]  ;;  %s801_s16 = sshll.u32 %s1173_s13, 7  ;;  %s678_s13 = scalar_lea.sflag [#allocation4], %s1256_s24 }
  0x4a   : > { %924 = vmatprep.subr.bf16.mxu0 %v1098_v0  ;;  %v799_v60 = vld [vmem:[%s1449_s8] ss:$0 sm:$0xff]  ;;  %s1397_s2 = scalar_lea.hbm %s1450_s9, %s801_s16  ;;  %p1032_p4 = pneg %p1031_p12 }
  0x4c   : > { %911 = vmatpush3.bf16.msra.mxu1 %v910_v14  ;;  %p1039_p5 = pnand %p1038_p3, %p1032_p4 }
  0x4d   : > { %912 = vmatprep.subr.bf16.mxu1 %v1098_v0  ;;  %926 = vmatpush3.bf16.msra.mxu0 %v925_v30 }
  0x4e   : > { %927 = vmatprep.subr.bf16.mxu0 %v1098_v0 }
  0x50   : > { %914 = vmatpush3.bf16.msra.mxu1 %v913_v17 }
  0x51   : > { %915 = vmatprep.subr.bf16.mxu1 %v1098_v0  ;;  %929 = vmatpush3.bf16.msra.mxu0 %v928_v33 }
  0x52   : > { %930 = vmatprep.subr.bf16.mxu0 %v1098_v0 }
  0x54   : > { %917 = vmatpush3.bf16.msra.mxu1 %v916_v20 }
  0x55   : > { %932 = vmatpush3.bf16.msra.mxu0 %v931_v36 }
  0x56   : > { %933 = vmatprep.subr.bf16.mxu0 %v1098_v0 }
  0x57   : > { %863 = vmatmul.mubr.msk.f32.vlgmr.msra.gmra.mrb[2].mxu1 %vm485_vm2, %v469_v21 }
  0x59   : > { %935 = vmatpush3.bf16.msra.mxu0 %v934_v39 }
  0x5a   : > { %936 = vmatprep.subr.bf16.mxu0 %v1098_v0 }
  0x5d   : > { %938 = vmatpush3.bf16.msra.mxu0 %v937_v42 }
  0x5e   : > { %939 = vmatprep.subr.bf16.mxu0 %v1098_v0 }
  0x61   : > { %941 = vmatpush3.bf16.msra.mxu0 %v940_v45 }
 0x11a   : > { %v464_v46 = vpop.f32.mrb[0].mxu1 }
 0x11b   : > { %v845_v47 = vpop.f32.mrb[1].mxu1  ;;  %v465_v49 = vadd.f32 %v795_v48, %v464_v46 }
 0x11d   : > { %991 = vtanh.f32 %v465_v49 }
 0x127   : > { %v992_v54 = vpop.eup %991 }
 0x12a   : > { %v555_v51 = vpop.f32.mrb[2].mxu1 }
 0x12b   : > { %v556_v52 = vadd.f32 %v797_v50, %v555_v51  ;;  %v864_v53 = vpop.f32.mrb[3].mxu1 }
 0x12d   : > { %993 = vtanh.f32 %v556_v52 }
 0x137   : > { %v994_v55 = vpop.eup %993 }
 0x138   : > { %v560_v57 = vadd.f32 %v994_v55, %v992_v54 }
 0x13a   : > { %v562_v58 = vadd.f32 %v561_v56, %v560_v57 }
 0x13c   : > { %v563_v59 = vmul.f32 0.33333334, %v562_v58 }
 0x13e   : > { %898 = vmatmul.mubr.f32.vlgmr.msra.gmra.mrb[0].mxu0 %v563_v59 }
 0x211   : > { %v653_v61 = vpop.f32.mrb[0].mxu0 }
 0x212   : > { %v654_v62 = vadd.f32 %v799_v60, %v653_v61  ;;  %v899_v63 = vpop.f32.mrb[1].mxu0 }
 0x214   : > { %v658_v0 = vand.u32 2147483647, %v654_v62  ;;  %v657_v13 = vmax.f32 %v654_v62, 0.0 }
 0x216   : > { %v659_v1 = vsub.f32 0.0, %v658_v0 }
 0x218   : > { %v660_v2 = vmul.f32 1.442695, %v659_v1 }
 0x21a   : > { %995 = vpow2.f32 %v660_v2 }
 0x224   : > { %v996_v3 = vpop.eup %995 }
 0x225   : > { %v662_v4 = vadd.f32 1.0, %v996_v3  ;;  %v665_v5 = vmul.f32 -0.5, %v996_v3  ;;  %v668_v8 = vand.u32 2147483647, %v996_v3 }
 0x227   : > { %997 = vlog2.f32 %v662_v4  ;;  %v666_v7 = vadd.f32 1.0, %v665_v5  ;;  %vm669_vm3 = vcmp.lt.f32.partialorder %v668_v8, 0.0004427343 }
 0x229   : > { %v667_v12 = vmul.f32 %v996_v3, %v666_v7 }
 0x231   : > { %v998_v10 = vpop.eup %997 }
 0x232   : > { %v664_v11 = vmul.f32 0.6931472, %v998_v10 }
 0x234   : > { %v670_v14 = vsel %vm669_vm3, %v667_v12, %v664_v11 }
 0x235   : > { %v671_v15 = vadd.f32 %v670_v14, %v657_v13 }
 0x237   : > { %v675_v16 = vsel %vm674_vm4, %v654_v62, %v671_v15 }
 0x238   : > { %676 = vst.msk [vmem:[%s373_s26] sm:$0xff] %vm394_vm1, %v675_v16 }
 0x239   : > { %1042 = shalt.err (!%p1039_p5)
}
 0x23a   : > { %s1043_s24 = scalar_lea.hbm %s1397_s2, 128  ;;  %s1047_s28 = scalar_lea.hbm %s1450_s9, 384 }
 0x23b   : > { %p1044_p7 = scmp.ne.s32.totalorder %s1397_s2, %s1043_s24  ;;  %p1048_p0 = scmp.lt.u32.totalorder %s1397_s2, %s1450_s9 }
 0x23c   : > { %p1049_p2 = scmp.lt.u32.totalorder %s1047_s28, %s1043_s24  ;;  %p1051_p6 = scmp.lt.u32.totalorder %s1043_s24, %s1397_s2 }
 0x23d   : > { %p1045_p8 = pnand %p1044_p7, %p1463_p11 }
 0x23e   : > { %p1050_p10 = por %p1049_p2, %p1048_p0 }
 0x23f   : > { %p1046_p13 = pneg %p1045_p8 }
 0x240   : > { %p1052_p12 = por %p1051_p6, %p1050_p10 }
 0x242   : > { %p1053_p4 = pnand %p1052_p12, %p1046_p13 }
 0x244   : > { %1056 = shalt.err (!%p1053_p4)
}
 0x245   : > { %944 = dma.vmem_to_hbm [thread:$0]  (%p1463_p11), %s1399_s27, 128, %s1397_s2, %s678_s13  }
 0x246 PF: > { %p955_p9 = scmp.ge.s32.totalorder %s1095_s12, 2  ;;  %s703_s14 = sand.u32 1, %s1083_s30  }
 0x247   : > { %p1464_p1 = scmp.ne.s32.totalorder %s1457_s22, 0  ;;  %s704_s17 = scalar_lea.sflag [#allocation4], %s703_s14 }
 0x249   : > { %p951_p3 = pnand %p955_p9, %p1464_p1 }
 0x24b   : > { %1078 = dma.done.wait (!%p951_p3), %s704_s17, 128  }
 0x24c   : > { %1080 = vsyncadd (!%p951_p3), %s704_s17, 4294967168  ;;  %p22_p5 = scmp.ge.s32.totalorder %s1177_s15, 5   ;;  %s1465_s30 = smov %s1087_s10 }
 0x24d   : > { %s1466_s10 = smov %s1091_s11  ;;  %s1467_s11 = smov %s1189_s18 }
 0x24e   : > { %s1468_s12 = smov %s1177_s15  ;;  %24 = sbr.rel (!%p22_p5) target bundleno = 7 (0x7), region = 107 }
 0x255   :  { %709 = vsyncpa [#allocation3], 1 }
 0x256   :  { %711 = vsyncpa [#allocation3 + $0x1], 1 }
 0x257   :  { %712 = vsyncpa [#allocation4], 1 }
 0x258   :  { %714 = vsyncpa [#allocation4 + $0x1], 1 }

</bundles_post_ra>
